<compile_context>
chip_gen: v6e
topology: v6e:2x2x1
jax: 0.10.0
libtpu: 0.0.40
codegen_flags: <defaults>
</compile_context>

<pallas_src>
import jax
import jax.numpy as jnp
import numpy as np
from jax import lax
from jax.experimental import pallas as pl
from jax.experimental.pallas import tpu as pltpu

_LANE = 128


# ----------------------------- Pallas kernel --------------------------------

def _fused_dag_kernel(at_ref, w_ref, br_ref, mg_ref):
    """One MXU pass serves DAG nodes 0, 1 and 2.

    at_ref : (Cin*9+1, tm)   bf16  im2col^T tile with a trailing ones row
    w_ref  : (2*Cout, Cin*9+1) bf16  [W0; W1] with the biases folded as a column
    br_ref : (2*Cout, tm)    f32   per-branch conv outputs (nodes 0 and 1)
    mg_ref : (Cout,  tm)     f32   relu(branch0 + branch1)  (node 2 epilogue)
    """
    p = jnp.dot(w_ref[...], at_ref[...], preferred_element_type=jnp.float32)
    br_ref[...] = p
    cout = mg_ref.shape[0]
    # Cout = 8 -> the two halves are 8-sublane aligned slices: cheap add + ReLU.
    mg_ref[...] = jnp.maximum(p[:cout, :] + p[cout:, :], 0.0)


# --------------------------- tiling heuristics -------------------------------

def _pick_lane_tile(m128, bytes_per_lane, vmem_budget=12 * 1024 * 1024):
    """K- and VMEM-aware lane tile (m128 is M rounded up to a multiple of 128).

    * bytes_per_lane = single-buffer VMEM bytes needed per lane column of one
      grid step (A^T bf16 rows + both f32 output rows); double-buffering (2x)
      is applied here.  Budget is kept under the 16 MiB v5e scoped-VMEM floor
      so the same tile also fits v6e (32 MiB default) and v7x (64 MiB phys).
    * Small problems run as a single grid step (the ~0.35 us/step overhead
      would dominate otherwise); large problems expose >= 2 steps so the
      "parallel" grid axis can shard across v7x's two TensorCores.
    """
    cap = max(_LANE, (vmem_budget // (2 * bytes_per_lane)) // _LANE * _LANE)
    target = min(cap, 4096)
    if m128 <= target:
        return m128                       # single step (toy / small M)
    steps = max(2, pl.cdiv(m128, target))  # >= 2 steps at real sizes (megacore)
    return pl.cdiv(pl.cdiv(m128, steps), _LANE) * _LANE


# ------------------- fused dual-conv + merge pipeline ------------------------

class _FusedDualConvMerge:
    """DAG nodes 0, 1 (3x3 'same' convs) and 2 (sum over branches + ReLU),
    implemented with a SINGLE Pallas kernel invocation shared by the three
    node modules.

    * branch(i)(x) returns exactly conv_i(x) in NCHW (per-node semantics).
    * merge(stacked) returns relu(sum(stacked, axis=1)); for this DAG the
      stacked input is exactly stack([node0, node1], dim=1), whose sum+ReLU
      was already computed in the kernel epilogue from the same f32
      accumulators -- bit-identical, so the fused result is returned (CSE)
      and the dead stack/reshape glue is DCE'd by XLA under jit.
    * An instance is constructed inside the jitted forward, so its Python
      state spans exactly one trace (no cross-trace caching hazards).
    """

    def __init__(self, w0, b0, w1, b1):
        cout = w0.shape[0]
        self.cout = cout
        wmat = jnp.concatenate(
            [w0.reshape(cout, -1), w1.reshape(cout, -1)], axis=0)   # (2Cout, Cin*9)
        bias = jnp.concatenate([b0, b1], axis=0).reshape(2 * cout, 1)
        # Bias folded into the GEMM: W_ext = [W | b]; A^T gets a ones row.
        self.w_ext = jnp.concatenate([wmat, bias], axis=1).astype(jnp.bfloat16)
        self._branches = None
        self._merged = None
        self._traced_input = None

    def _run(self, x):
        n, cin, h, w = x.shape
        m = n * h * w
        k1 = cin * 9 + 1
        cout = self.cout
        co2 = 2 * cout

        # Shared im2col^T, built ONCE for both conv branches, directly in
        # (K, M) layout so the GEMM output is lane-dense.  Traces into the
        # single jitted executable together with the kernel.
        # TODO(synk): at realistic channel counts, lower this to 9 shifted
        # matmul-accumulates over an NHWC block inside the kernel (removes the
        # 9x HBM read amplification); at Cin=4 the patch matrix is ~40 KB.
        xpad = jnp.pad(x, ((0, 0), (0, 0), (1, 1), (1, 1)))
        cols = [xpad[:, :, kh:kh + h, kw:kw + w]
                for kh in range(3) for kw in range(3)]
        patches = jnp.stack(cols, axis=2)                     # (N, Cin, 9, H, W)
        at = patches.transpose(1, 2, 0, 3, 4).reshape(cin * 9, m)
        at = jnp.concatenate([at, jnp.ones((1, m), at.dtype)], axis=0)  # bias row
        at = at.astype(jnp.bfloat16)                          # bf16 MXU inputs

        # K/VMEM-aware lane tiling; pl.cdiv padding keeps non-pow2 M tiled.
        m128 = pl.cdiv(m, _LANE) * _LANE
        bytes_per_lane = k1 * 2 + co2 * 4 + cout * 4          # bf16 in, f32 outs
        tm = _pick_lane_tile(m128, bytes_per_lane)
        mpad = pl.cdiv(m, tm) * tm
        if mpad != m:
            at = jnp.pad(at, ((0, 0), (0, mpad - m)))

        br, mg = pl.pallas_call(
            _fused_dag_kernel,
            out_shape=(
                jax.ShapeDtypeStruct((co2, mpad), jnp.float32),
                jax.ShapeDtypeStruct((cout, mpad), jnp.float32),
            ),
            grid=(mpad // tm,),
            in_specs=[
                pl.BlockSpec((k1, tm), lambda i: (0, i)),      # A^T tile (lane-dense)
                pl.BlockSpec((co2, k1), lambda i: (0, 0)),     # weights resident
            ],
            out_specs=(
                pl.BlockSpec((co2, tm), lambda i: (0, i)),     # branch pre-acts
                pl.BlockSpec((cout, tm), lambda i: (0, i)),    # fused relu(sum)
            ),
            compiler_params=pltpu.CompilerParams(
                dimension_semantics=("parallel",),   # shards across v7x's 2 TCs
                vmem_limit_bytes=16 * 1024 * 1024,   # explicit; fits every gen
            ),
        )(at, self.w_ext)

        br = br[:, :m]
        mg = mg[:, :m]
        # Per-node results back in NCHW.  The branch reshapes are consumed
        # only if another node needs the raw conv outputs; for this DAG node 2
        # uses the in-kernel fused result, so XLA DCEs them.
        br_nchw = br.reshape(2, cout, n, h, w).transpose(0, 2, 1, 3, 4)
        self._branches = (br_nchw[0], br_nchw[1])
        self._merged = mg.reshape(cout, n, h, w).transpose(1, 0, 2, 3)
        self._traced_input = x

    def branch(self, which):
        def f(x):
            if self._branches is None:
                self._run(x)
            else:
                assert self._traced_input is x, (
                    "shared dual-conv pipeline reused with a different input; "
                    "construct a fresh pipeline per forward")
            return self._branches[which]
        return f

    def merge(self, stacked):
        # Node 2: relu(sum over the stacked-branch axis).
        if self._merged is not None and stacked.shape[1] == 2:
            return self._merged              # bit-identical fused result (CSE)
        # Generic fallback for other DAG instantiations (never taken here).
        return jnp.maximum(jnp.sum(stacked, axis=1), 0.0)


# ------------------------- Submodule (DAG executor) --------------------------

class Submodule:
    """Faithful port of the PyTorch Submodule forward semantics."""

    def __init__(self, moduleList, dependency, output, fitlist):
        self.moduleList = moduleList
        self.dependency = dependency
        self.fitlist = fitlist
        self.size = len(moduleList)

    def moduleForward(self, idx, cache):
        if idx == -1:
            return cache[-1]
        modulein = []
        for i in self.dependency[idx]:
            if not self.fitlist[i] and i != -1:
                ct = i
                while not self.fitlist[ct]:
                    assert len(self.dependency[ct]) == 1, \
                        'skip fit should depend on only one input'
                    ct = self.dependency[ct][0]
                    if ct == -1:
                        break
                cidx = ct
            else:
                cidx = i
            if cache[cidx] is not None:
                modulein.append(cache[cidx])
            else:
                modulein.append(self.moduleForward(cidx, cache))
        if len(modulein) == 1:
            modulein = modulein[0]
        else:
            modulein = jnp.stack(modulein, axis=1)
        result = self.moduleList[idx](modulein)
        cache[idx] = result
        return result

    def forward(self, x, output):
        outlist = []
        outidxlist = []
        cache = [None] * (len(self.moduleList) + 1)
        cache[-1] = x
        for i in output:
            ct = i
            processed = False
            if ct == -1:
                outidxlist.append(ct)
            else:
                while not self.fitlist[ct]:
                    if len(self.dependency[ct]) == 1:
                        ct = self.dependency[ct][0]
                    else:
                        for k in self.dependency[ct]:
                            assert self.fitlist[k], \
                                'does not support multiple dependency with fit module to be False'
                            outidxlist.append(k)
                            processed = True
                        break
                if not processed:
                    outidxlist.append(ct)
        for ct in outidxlist:
            outlist.append(self.moduleForward(ct, cache))
        if len(outlist) == 1:
            return outlist[0]
        return outlist


# ------------------------- jitted end-to-end forward -------------------------

@jax.jit
def dag_forward(x, w0, b0, w1, b1):
    """Whole DAG forward in ONE compiled executable: the im2col glue, the
    single fused Pallas call and the executor's Python-level DAG walk all
    trace together (removes per-op dispatch latency on this tiny workload)."""
    pipe = _FusedDualConvMerge(w0, b0, w1, b1)      # fresh per trace
    module_list = [
        pipe.branch(0),     # node 0: Conv2d(Cin -> Cout, 3x3, same)
        pipe.branch(1),     # node 1: Conv2d(Cin -> Cout, 3x3, same)
        pipe.merge,         # node 2: consumes stack(dim=1) -> sum + ReLU
        lambda t: t,        # node 3: Identity, fit=False -> skipped by walk
    ]
    dependency = [[-1], [-1], [0, 1], [2]]
    fitlist = [True, True, True, False]
    output = [3]
    submod = Submodule(module_list, dependency, output, fitlist)
    return submod.forward(x, output)


# ---------------------------------- main -------------------------------------

if __name__ == "__main__":
    key = jax.random.PRNGKey(0)
    kx, kw0, kb0, kw1, kb1 = jax.random.split(key, 5)

    N, Cin, H, W = 2, 4, 16, 16
    Cout = 8

    x = jax.random.normal(kx, (N, Cin, H, W), dtype=jnp.float32)
    w0 = jax.random.normal(kw0, (Cout, Cin, 3, 3), dtype=jnp.float32) * 0.1
    b0 = jax.random.normal(kb0, (Cout,), dtype=jnp.float32) * 0.1
    w1 = jax.random.normal(kw1, (Cout, Cin, 3, 3), dtype=jnp.float32) * 0.1
    b1 = jax.random.normal(kb1, (Cout,), dtype=jnp.float32) * 0.1

    out = jax.block_until_ready(dag_forward(x, w0, b0, w1, b1))

    # Reference check against plain-JAX f32 conv (tolerance widened for the
    # bf16-input / f32-accumulate MXU path).
    def conv_ref(xx, ww, bb):
        return lax.conv_general_dilated(
            xx, ww, window_strides=(1, 1), padding="SAME",
            dimension_numbers=("NCHW", "OIHW", "NCHW"),
        ) + bb.reshape(1, -1, 1, 1)

    ref = jnp.maximum(conv_ref(x, w0, b0) + conv_ref(x, w1, b1), 0.0)
    assert out.shape == (N, Cout, H, W)
    assert np.allclose(np.asarray(out), np.asarray(ref), atol=5e-2, rtol=5e-2)

    print("KERNEL_OK")
</pallas_src>

<mosaic_0001>
module attributes {stable_mosaic.version = 11 : i64} {
  func.func @_fused_dag_kernel(%arg0: i32, %arg1: memref<37x512xbf16, #tpu.memory_space<vmem>>, %arg2: memref<16x37xbf16, #tpu.memory_space<vmem>>, %arg3: memref<16x512xf32, #tpu.memory_space<vmem>>, %arg4: memref<8x512xf32, #tpu.memory_space<vmem>>) attributes {dimension_semantics = [#tpu.dimension_semantics<parallel>], iteration_bounds = array<i64: 1>, scalar_prefetch = 0 : i64, scratch_operands = 0 : i64, tpu.core_type = #tpu.core_type<tc>, window_params = [{transform_indices = @transform_0, window_bounds = array<i64: 37, 512>}, {pipeline_mode = #tpu.pipeline_mode<synchronous>, transform_indices = @transform_1, window_bounds = array<i64: 16, 37>}, {transform_indices = @transform_2, window_bounds = array<i64: 16, 512>}, {transform_indices = @transform_3, window_bounds = array<i64: 8, 512>}]} {
    %c0 = arith.constant 0 : index
    %c0_0 = arith.constant 0 : index
    %0 = vector.load %arg2[%c0, %c0_0] : memref<16x37xbf16, #tpu.memory_space<vmem>>, vector<16x37xbf16>
    %c0_1 = arith.constant 0 : index
    %c0_2 = arith.constant 0 : index
    %1 = vector.load %arg1[%c0_1, %c0_2] : memref<37x512xbf16, #tpu.memory_space<vmem>>, vector<37x512xbf16>
    %cst = arith.constant dense<0.000000e+00> : vector<16x512xf32>
    %2 = tpu.matmul %0, %1, %cst {dimension_numbers = #tpu.dot_dimension_numbers<[1], [0], [0], [1], [0, 0, 1, 1], [], []>} : vector<16x37xbf16>, vector<37x512xbf16>, vector<16x512xf32> -> vector<16x512xf32>
    %c0_3 = arith.constant 0 : index
    %c0_4 = arith.constant 0 : index
    %3 = vector.load %arg3[%c0_3, %c0_4] : memref<16x512xf32, #tpu.memory_space<vmem>>, vector<16x512xf32>
    tpu.vector_store %arg3[%c0_3, %c0_4], %2 {strides = array<i32>} : memref<16x512xf32, #tpu.memory_space<vmem>>, vector<16x512xf32>,
    %4 = vector.extract_strided_slice %2 {offsets = [0, 0], sizes = [8, 512], strides = [1, 1]} : vector<16x512xf32> to vector<8x512xf32>
    %5 = vector.extract_strided_slice %2 {offsets = [8, 0], sizes = [8, 512], strides = [1, 1]} : vector<16x512xf32> to vector<8x512xf32>
    %6 = arith.addf %4, %5 : vector<8x512xf32>
    %cst_5 = arith.constant 0.000000e+00 : f32
    %7 = vector.broadcast %cst_5 : f32 to vector<8x512xf32>
    %8 = arith.maximumf %6, %7 : vector<8x512xf32>
    %c0_6 = arith.constant 0 : index
    %c0_7 = arith.constant 0 : index
    %9 = vector.load %arg4[%c0_6, %c0_7] : memref<8x512xf32, #tpu.memory_space<vmem>>, vector<8x512xf32>
    tpu.vector_store %arg4[%c0_6, %c0_7], %8 {strides = array<i32>} : memref<8x512xf32, #tpu.memory_space<vmem>>, vector<8x512xf32>,
    return
  }
  func.func @transform_0(%arg0: i32) -> (i32, i32) {
    %c0_i32 = arith.constant 0 : i32
    %c0_i32_0 = arith.constant 0 : i32
    return %c0_i32, %arg0 : i32, i32
  }
  func.func @transform_1(%arg0: i32) -> (i32, i32) {
    %c0_i32 = arith.constant 0 : i32
    %c0_i32_0 = arith.constant 0 : i32
    %c0_i32_1 = arith.constant 0 : i32
    return %c0_i32, %c0_i32_0 : i32, i32
  }
  func.func @transform_2(%arg0: i32) -> (i32, i32) {
    %c0_i32 = arith.constant 0 : i32
    %c0_i32_0 = arith.constant 0 : i32
    return %c0_i32, %arg0 : i32, i32
  }
  func.func @transform_3(%arg0: i32) -> (i32, i32) {
    %c0_i32 = arith.constant 0 : i32
    %c0_i32_0 = arith.constant 0 : i32
    return %c0_i32, %arg0 : i32, i32
  }
}

</mosaic_0001>

<bundles_post_ra>
// kernel: dag_forward.1
= control target key start
LH: loop header
LB: loop body
LE: loop exit
PB: predicated region body
PF: predicated region fallthrough
CT: control target
= control target key end

     0   :  { %vm86_vm0 = vcmask 1041408   ;;  %vm87_vm1 = vcmask 1042432   ;;  %v287_v2 = vmov 65535   ;;  %v288_v12 = vmov 0   ;;  %s360_s0 = inlined_call_operand.vmem [shape: bf16[37,512], index: 0, kind: input, shape index: {}]   ;;  %s361_s1 = inlined_call_operand.vmem [shape: bf16[16,37], index: 1, kind: input, shape index: {}]   ;;  %s362_s2 = inlined_call_operand.hbm [shape: f32[16,512], index: 2, kind: output, shape index: {0}]   ;;  %s363_s3 = inlined_call_operand.vmem [shape: f32[8,512], index: 3, kind: output, shape index: {1}]  }
   0x1   :  { %v25_v0 = vld [vmem:[%s360_s0 + $0x40] sm:$0x77]  ;;  %v88_v3 = vsel %vm86_vm0, 4294967295, %v287_v2  ;;  %v26_v4 = vld [vmem:[%s360_s0 + $0x48] sm:$0x77]  ;;  %134 = vmatprep.mubr.bf16.mxu0 %v288_v12  ;;  %177 = vmatprep.mubr.bf16.mxu1 %v288_v12 }
   0x2   :  { %v238_v1 = vcombine.high %v25_v0, %v25_v0  ;;  %v237_v5 = vcombine.low %v25_v0, %v25_v0  ;;  %v89_v6 = vsel %vm87_vm1, %v88_v3, 0  ;;  %v240_v7 = vcombine.high %v26_v4, %v26_v4  ;;  %v252_v11 = vld [vmem:[%s360_s0 + $0x24] ss:$16 sps:$4 sm:$0xff]   ;;  %v254_v15 = vld [vmem:[%s360_s0 + $0x2c] ss:$16 sps:$4 sm:$0xff]  }
   0x3   :  { %v239_v8 = vcombine.low %v26_v4, %v26_v4  ;;  %v256_v16 = vld [vmem:[%s360_s0 + $0x20] ss:$16 sps:$4 sm:$0xff]   ;;  %v257_v17 = vld [vmem:[%s360_s0 + $0x28] ss:$16 sps:$4 sm:$0xff]   ;;  %v258_v18 = vld [vmem:[%s360_s0 + $0x4] ss:$16 sps:$4 sm:$0xff]  }
   0x4   :  { %v94_v9 = vand.u32 %v238_v1, %v89_v6  ;;  %v91_v10 = vand.u32 %v237_v5, %v89_v6  ;;  %v100_v13 = vand.u32 %v240_v7, %v89_v6 }
   0x5   :  { %v97_v14 = vand.u32 %v239_v8, %v89_v6 }
   0x6   :  { %112 = vmatprep.subr.bf16.mxu0 %v94_v9  ;;  %155 = vmatprep.subr.bf16.mxu1 %v100_v13 }
   0x7   :  { %113 = vmatpush1.bf16.msra.mxu0 %v91_v10  ;;  %156 = vmatpush1.bf16.msra.mxu1 %v97_v14 }
   0x8   :  { %114 = vmatprep.subr.bf16.mxu0 %v252_v11 }
   0x9   :  { %9 = vsyncpa [#allocation3], 0  ;;  %157 = vmatprep.subr.bf16.mxu1 %v254_v15  ;;  %v260_v19 = vld [vmem:[%s360_s0 + $0xc] ss:$16 sps:$4 sm:$0xff]   ;;  %v262_v20 = vld [vmem:[%s360_s0] ss:$16 sps:$4 sm:$0xff]  }
   0xa   :  { %v263_v21 = vld [vmem:[%s360_s0 + $0x8] ss:$16 sps:$4 sm:$0xff]   ;;  %v264_v22 = vld [vmem:[%s361_s1] sm:$0xff]   ;;  %vm82_vm2 = vcmask 302080   ;;  %s289_s7 = smov [#allocation2]  }
   0xb   :  { %115 = vmatpush1.bf16.msra.mxu0 %v256_v16  ;;  %158 = vmatpush1.bf16.msra.mxu1 %v257_v17  ;;  %s213_s8 = sshll.u32 %s289_s7, 4  ;;  %s214_s8 = int_to_ptr.vmem [resolvable:$true] %s213_s8 }
   0xc   :  { %116 = vmatprep.subr.bf16.mxu0 %v258_v18  ;;  %159 = vmatprep.subr.bf16.mxu1 %v260_v19  ;;  %s265_s9 = scalar_lea.vmem %s214_s8, 1024  ;;  %p270_p1 = scmp.lt.s32.totalorder %s214_s8, %s214_s8 }
   0xd   :  { %p266_p0 = scmp.ne.s32.totalorder %s214_s8, %s265_s9  ;;  %p271_p2 = scmp.lt.s32.totalorder %s265_s9, %s265_s9 }
   0xf   :  { %117 = vmatpush1.bf16.msra.mxu0 %v262_v20  ;;  %160 = vmatpush1.bf16.msra.mxu1 %v263_v21  ;;  %p272_p3 = por %p271_p2, %p270_p1 }
  0x11   :  { %p273_p4 = pnand %p272_p3, %p266_p0 }
  0x12   :  { %241 = vmatmul.mubr.msk.bf16.vlgmr.msra.gmra.mxu0 %vm82_vm2, %v264_v22  ;;  %242 = vmatmul.mubr.msk.bf16.vlgmr.msra.gmra.mxu1 %vm82_vm2, %v264_v22 }
  0xd2   :  { %v136_v23 = vpop.f32.mrf.mxu0  ;;  %v179_v24 = vpop.f32.mrf.mxu1 }
  0xd3   :  { %188 = vst [vmem:[#allocation2] sm:$0xff] %v136_v23  ;;  %190 = vst [vmem:[#allocation2 + $0x10] sm:$0xff] %v179_v24 }
  0xd4   :  { %v138_v25 = vpop.f32.mrf.mxu0  ;;  %v181_v26 = vpop.f32.mrf.mxu1 }
  0xd5   :  { %189 = vst [vmem:[#allocation2 + $0x8] sm:$0xff] %v138_v25  ;;  %191 = vst [vmem:[#allocation2 + $0x18] sm:$0xff] %v181_v26 }
  0xd6   :  { %v140_v27 = vpop.f32.mrf.mxu0  ;;  %v183_v29 = vpop.f32.mrf.mxu1 }
  0xd7   :  { %192 = vst [vmem:[#allocation2 + $0x20] sm:$0xff] %v140_v27  ;;  %v196_v28 = vadd.f32 %v140_v27, %v136_v23  ;;  %194 = vst [vmem:[#allocation2 + $0x30] sm:$0xff] %v183_v29  ;;  %v198_v30 = vadd.f32 %v183_v29, %v179_v24 }
  0xd8   :  { %v142_v31 = vpop.f32.mrf.mxu0  ;;  %v185_v34 = vpop.f32.mrf.mxu1 }
  0xd9   :  { %v200_v32 = vmax.f32 %v196_v28, 0.0  ;;  %193 = vst [vmem:[#allocation2 + $0x28] sm:$0xff] %v142_v31  ;;  %v197_v33 = vadd.f32 %v142_v31, %v138_v25  ;;  %v202_v35 = vmax.f32 %v198_v30, 0.0  ;;  %195 = vst [vmem:[#allocation2 + $0x38] sm:$0xff] %v185_v34  ;;  %v199_v36 = vadd.f32 %v185_v34, %v181_v26 }
  0xdb   :  { %204 = vst [vmem:[%s363_s3] sm:$0xff] %v200_v32  ;;  %v201_v37 = vmax.f32 %v197_v33, 0.0 }
  0xdc   :  { %276 = shalt.err (!%p273_p4)
}
  0xdd   :  { %s290_s10 = smov 512   ;;  %s291_s11 = smov 32   ;;  %206 = vst [vmem:[%s363_s3 + $0x10] sm:$0xff] %v202_v35  ;;  %v203_v38 = vmax.f32 %v199_v36, 0.0  ;;  %205 = vst [vmem:[%s363_s3 + $0x8] sm:$0xff] %v201_v37 }
  0xde   :  { %219 = dma.vmem_to_hbm [thread:$0]  %s214_s8, 1024, %s362_s2, [#allocation3], %s290_s10, %s290_s10, %s291_s11  }
  0xdf   :  { %207 = vst [vmem:[%s363_s3 + $0x18] sm:$0xff] %v203_v38 }
  0xe0   :  { %285 = dma.done.wait [#allocation3], 1024  }
  0xe1   :  { %286 = vsyncadd [#allocation3], 4294966272 }
  0xe2   :  { %227 = vsyncpa [#allocation3], 1 }

</bundles_post_ra>
